<compile_context>
chip_gen: v5e
topology: v5e:2x2
jax: 0.10.0
libtpu: 0.0.40
codegen_flags: <defaults>
</compile_context>

<pallas_src>
import jax
import jax.numpy as jnp
from jax import lax
from jax.experimental import pallas as pl
from jax.experimental.pallas import tpu as pltpu

MARGIN = 0.5


def _round_up(x, m):
    return ((x + m - 1) // m) * m


def _vmem_limit_bytes():
    try:
        cap = int(pltpu.get_tpu_info().vmem_capacity_bytes)
    except Exception:
        cap = 64 * 2**20
    return int(min(max(cap * 85 // 100, 16 * 2**20), 128 * 2**20))


def _triplet_mg_kernel(qlab_ref, klab_ref, kvalid_ref, sqq_ref, sqk_ref,
                       qT_ref, k_ref, out_ref):
    tq = qT_ref.shape[1]
    Bk = k_ref.shape[0]

    # Gram block on the MXU: (B_pad, D_pad) x (D_pad, tq) -> (B_pad, tq), f32 acc.
    dot = jnp.dot(k_ref[...], qT_ref[...], preferred_element_type=jnp.float32)

    sq_q = sqq_ref[...]                  # (1, tq)  f32  (precomputed in wrapper)
    sq_k = sqk_ref[...]                  # (Bk, 1)  f32  (precomputed in wrapper)
    dist2 = jnp.maximum(sq_k + sq_q - 2.0 * dot, 0.0)          # squared distances

    qlab = qlab_ref[...]                 # (1, tq)  int32
    klab = klab_ref[...]                 # (Bk, 1)  int32
    kvalid = kvalid_ref[...] != 0        # (Bk, 1)  bool (real vs padded key rows)

    col_g = pl.program_id(0) * tq + lax.broadcasted_iota(jnp.int32, (1, tq), 1)
    row_g = lax.broadcasted_iota(jnp.int32, (Bk, 1), 0)
    not_self = row_g != col_g            # (Bk, tq) bool

    labels_eq = klab == qlab             # (Bk, tq) bool
    pos_mask = labels_eq & not_self & kvalid
    neg_mask = jnp.logical_not(labels_eq) & kvalid

    # Batch-hard mining in the SQUARED domain (monotone under sqrt); only the
    # two selected (1, tq) vectors get sqrt'ed.
    hp2 = jnp.max(jnp.where(pos_mask, dist2, 0.0), axis=0, keepdims=True)
    big = jnp.float32(1e9)
    hn2 = jnp.min(jnp.where(neg_mask, dist2, big), axis=0, keepdims=True)
    # Degenerate rows (no valid negative): reference yields min_j(dist + max) == max.
    # For normalized rows dist2 <= 4, so hn2 > 4.5 <=> "no negative was found".
    max2 = jnp.max(jnp.where(kvalid, dist2, 0.0), axis=0, keepdims=True)
    hn2 = jnp.where(hn2 > 4.5, max2, hn2)

    hinge = jnp.maximum(jnp.sqrt(hp2) - jnp.sqrt(hn2) + MARGIN, 0.0)   # (1, tq)
    out_ref[...] = hinge                                               # lane-dense store


def triplet_mg_loss(labels, mg_embedding, *, tile_q=None, mxu_dtype=jnp.bfloat16):
    """labels: (B,) int; mg_embedding: (B, D) float. Scalar f32 loss matching
    TripletMG.forward (L2-normalize + batch-hard triplet loss, margin=0.5).
    mxu_dtype=jnp.float32 gives exact parity with the f32 reference."""
    B, D = mg_embedding.shape
    lab = labels.astype(jnp.int32).reshape(B)

    # ---- hoisted preprocessing (one-time XLA ops, not per grid step) ----
    emb = mg_embedding.astype(jnp.float32)
    norm = jnp.sqrt(jnp.sum(emb * emb, axis=1, keepdims=True))
    emb_n = emb / jnp.maximum(norm, 1e-12)               # torch F.normalize, eps=1e-12
    sq = jnp.sum(emb_n * emb_n, axis=1)                   # (B,)  ~1.0 (0 for zero rows)

    # ---- tiling ----
    if tile_q is None:
        tile_q = 128 if B > 128 else _round_up(B, 8)      # >=2 parallel steps when B > 128
    tile_q = max(8, _round_up(int(tile_q), 8))
    B_pad = _round_up(B, tile_q)
    if B_pad > tile_q and tile_q % 128 != 0:              # lane-dense blocks need 128-mult
        tile_q = _round_up(tile_q, 128)
        B_pad = _round_up(B, tile_q)
    num_tiles = B_pad // tile_q
    D_pad = _round_up(D, 128)                             # fill the MXU contraction dim

    emb_n = jnp.pad(emb_n, ((0, B_pad - B), (0, D_pad - D)))
    lab_p = jnp.pad(lab, (0, B_pad - B))
    sq_p = jnp.pad(sq, (0, B_pad - B)).astype(jnp.float32)
    valid = (jnp.arange(B_pad, dtype=jnp.int32) < B).astype(jnp.int32)

    keys = emb_n.astype(mxu_dtype)                        # (B_pad, D_pad) resident operand
    queries_t = keys.T                                    # (D_pad, B_pad) sliced per step

    qlab_row = lab_p.reshape(1, B_pad)
    klab_col = lab_p.reshape(B_pad, 1)
    kvalid_col = valid.reshape(B_pad, 1)
    sq_row = sq_p.reshape(1, B_pad)
    sq_col = sq_p.reshape(B_pad, 1)

    msize = jnp.dtype(mxu_dtype).itemsize
    cost = pl.CostEstimate(
        flops=2 * B_pad * B_pad * D_pad + 10 * B_pad * B_pad,
        transcendentals=2 * B_pad,
        bytes_accessed=2 * B_pad * D_pad * msize + 6 * B_pad * 4,
    )

    def _run(resident_pipeline_mode):
        kw = {} if resident_pipeline_mode is None else {"pipeline_mode": resident_pipeline_mode}
        in_specs = [
            pl.BlockSpec((1, tile_q), lambda i: (0, i)),                   # query labels (row)
            pl.BlockSpec((B_pad, 1), lambda i: (0, 0), **kw),              # key labels (resident)
            pl.BlockSpec((B_pad, 1), lambda i: (0, 0), **kw),              # key validity (resident)
            pl.BlockSpec((1, tile_q), lambda i: (0, i)),                   # query sq-norms (row)
            pl.BlockSpec((B_pad, 1), lambda i: (0, 0), **kw),              # key sq-norms (resident)
            pl.BlockSpec((D_pad, tile_q), lambda i: (0, i)),               # normalized queries^T
            pl.BlockSpec((B_pad, D_pad), lambda i: (0, 0), **kw),          # normalized keys (resident)
        ]
        return pl.pallas_call(
            _triplet_mg_kernel,
            out_shape=jax.ShapeDtypeStruct((1, B_pad), jnp.float32),
            grid=(num_tiles,),
            in_specs=in_specs,
            out_specs=pl.BlockSpec((1, tile_q), lambda i: (0, i)),         # lane-dense losses
            compiler_params=pltpu.CompilerParams(
                dimension_semantics=("parallel",),
                vmem_limit_bytes=_vmem_limit_bytes(),
            ),
            cost_estimate=cost,
        )(qlab_row, klab_col, kvalid_col, sq_row, sq_col, queries_t, keys)

    try:
        per_row = _run(pl.Buffered(1))   # single-buffer the grid-invariant operands
    except Exception:
        per_row = _run(None)             # safe fallback: default double-buffering

    # Mean over the *real* rows only (padded query columns excluded).
    return jnp.mean(per_row[0, :B])


def _reference(labels, emb):
    """Pure-JAX reference reproducing the PyTorch semantics (sanity check)."""
    emb = emb.astype(jnp.float32)
    nrm = jnp.sqrt(jnp.sum(emb * emb, axis=1, keepdims=True))
    emb = emb / jnp.maximum(nrm, 1e-12)
    dot = jnp.matmul(emb, emb.T, precision=lax.Precision.HIGHEST)
    sq = jnp.diag(dot)
    dist = jnp.maximum(sq[None, :] - 2.0 * dot + sq[:, None], 0.0)
    zm = (dist == 0.0).astype(jnp.float32)
    dist = jnp.sqrt(dist + zm * 1e-16) * (1.0 - zm)
    leq = labels[:, None] == labels[None, :]
    eye = jnp.eye(labels.shape[0], dtype=bool)
    mask_ap = (leq & ~eye).astype(jnp.float32)
    mask_an = (~leq).astype(jnp.float32)
    hp = jnp.max(mask_ap * dist, axis=1, keepdims=True)
    mx = jnp.max(dist, axis=1, keepdims=True)
    hn = jnp.min(dist + mx * (1.0 - mask_an), axis=1, keepdims=True)
    return jnp.mean(jnp.maximum(hp - hn + MARGIN, 0.0))


if __name__ == "__main__":
    key = jax.random.PRNGKey(0)
    k1, k2, k3, k4 = jax.random.split(key, 4)

    # Config A: tiny single-tile case (batch=8, hidden=32).
    B, D = 8, 32
    labels = jax.random.randint(k1, (B,), 0, 3, dtype=jnp.int32)
    emb = jax.random.normal(k2, (B, D), dtype=jnp.float32)
    ref = _reference(labels, emb)

    loss_f32 = jax.block_until_ready(triplet_mg_loss(labels, emb, mxu_dtype=jnp.float32))
    assert jnp.allclose(loss_f32, ref, rtol=1e-3, atol=1e-3), (loss_f32, ref)

    loss_bf16 = jax.block_until_ready(triplet_mg_loss(labels, emb))  # default bf16 MXU path
    assert jnp.allclose(loss_bf16, ref, rtol=5e-2, atol=5e-2), (loss_bf16, ref)

    # Config B: multi-tile grid + row/column/feature padding paths.
    B2, D2 = 130, 48
    labels2 = jax.random.randint(k3, (B2,), 0, 5, dtype=jnp.int32)
    emb2 = jax.random.normal(k4, (B2, D2), dtype=jnp.float32)
    ref2 = _reference(labels2, emb2)
    loss2 = jax.block_until_ready(triplet_mg_loss(labels2, emb2, mxu_dtype=jnp.float32))
    assert jnp.allclose(loss2, ref2, rtol=1e-3, atol=1e-3), (loss2, ref2)

    print("KERNEL_OK")
</pallas_src>

<mosaic_0001>
module attributes {stable_mosaic.version = 11 : i64} {
  func.func @_triplet_mg_kernel(%arg0: i32, %arg1: memref<1x8xi32, #tpu.memory_space<vmem>>, %arg2: memref<8x1xi32, #tpu.memory_space<vmem>>, %arg3: memref<8x1xi32, #tpu.memory_space<vmem>>, %arg4: memref<1x8xf32, #tpu.memory_space<vmem>>, %arg5: memref<8x1xf32, #tpu.memory_space<vmem>>, %arg6: memref<128x8xf32, #tpu.memory_space<vmem>>, %arg7: memref<8x128xf32, #tpu.memory_space<vmem>>, %arg8: memref<1x8xf32, #tpu.memory_space<vmem>>) attributes {dimension_semantics = [#tpu.dimension_semantics<parallel>], iteration_bounds = array<i64: 1>, scalar_prefetch = 0 : i64, scratch_operands = 0 : i64, tpu.core_type = #tpu.core_type<tc>, window_params = [{transform_indices = @transform_0, window_bounds = array<i64: 1, 8>}, {pipeline_mode = #tpu.pipeline_mode<synchronous>, transform_indices = @transform_1, window_bounds = array<i64: 8, 1>}, {pipeline_mode = #tpu.pipeline_mode<synchronous>, transform_indices = @transform_2, window_bounds = array<i64: 8, 1>}, {transform_indices = @transform_3, window_bounds = array<i64: 1, 8>}, {pipeline_mode = #tpu.pipeline_mode<synchronous>, transform_indices = @transform_4, window_bounds = array<i64: 8, 1>}, {transform_indices = @transform_5, window_bounds = array<i64: 128, 8>}, {pipeline_mode = #tpu.pipeline_mode<synchronous>, transform_indices = @transform_6, window_bounds = array<i64: 8, 128>}, {transform_indices = @transform_7, window_bounds = array<i64: 1, 8>}]} {
    %c0 = arith.constant 0 : index
    %c0_0 = arith.constant 0 : index
    %0 = vector.load %arg7[%c0, %c0_0] : memref<8x128xf32, #tpu.memory_space<vmem>>, vector<8x128xf32>
    %c0_1 = arith.constant 0 : index
    %c0_2 = arith.constant 0 : index
    %1 = vector.load %arg6[%c0_1, %c0_2] : memref<128x8xf32, #tpu.memory_space<vmem>>, vector<128x8xf32>
    %cst = arith.constant dense<0.000000e+00> : vector<8x8xf32>
    %2 = tpu.matmul %0, %1, %cst {dimension_numbers = #tpu.dot_dimension_numbers<[1], [0], [0], [1], [0, 0, 1, 1], [], []>} : vector<8x128xf32>, vector<128x8xf32>, vector<8x8xf32> -> vector<8x8xf32>
    %c0_3 = arith.constant 0 : index
    %c0_4 = arith.constant 0 : index
    %3 = vector.load %arg4[%c0_3, %c0_4] : memref<1x8xf32, #tpu.memory_space<vmem>>, vector<1x8xf32>
    %c0_5 = arith.constant 0 : index
    %c0_6 = arith.constant 0 : index
    %4 = vector.load %arg5[%c0_5, %c0_6] : memref<8x1xf32, #tpu.memory_space<vmem>>, vector<8x1xf32>
    %5 = vector.broadcast %4 : vector<8x1xf32> to vector<8x8xf32>
    %6 = vector.broadcast %3 : vector<1x8xf32> to vector<8x8xf32>
    %7 = arith.addf %5, %6 : vector<8x8xf32>
    %cst_7 = arith.constant 2.000000e+00 : f32
    %8 = vector.broadcast %cst_7 : f32 to vector<8x8xf32>
    %9 = arith.mulf %8, %2 : vector<8x8xf32>
    %10 = arith.subf %7, %9 : vector<8x8xf32>
    %cst_8 = arith.constant 0.000000e+00 : f32
    %11 = vector.broadcast %cst_8 : f32 to vector<8x8xf32>
    %12 = arith.maximumf %10, %11 : vector<8x8xf32>
    %c0_9 = arith.constant 0 : index
    %c0_10 = arith.constant 0 : index
    %13 = vector.load %arg1[%c0_9, %c0_10] : memref<1x8xi32, #tpu.memory_space<vmem>>, vector<1x8xi32>
    %c0_11 = arith.constant 0 : index
    %c0_12 = arith.constant 0 : index
    %14 = vector.load %arg2[%c0_11, %c0_12] : memref<8x1xi32, #tpu.memory_space<vmem>>, vector<8x1xi32>
    %c0_13 = arith.constant 0 : index
    %c0_14 = arith.constant 0 : index
    %15 = vector.load %arg3[%c0_13, %c0_14] : memref<8x1xi32, #tpu.memory_space<vmem>>, vector<8x1xi32>
    %c0_i32 = arith.constant 0 : i32
    %16 = vector.broadcast %c0_i32 : i32 to vector<8x1xi32>
    %17 = arith.cmpi ne, %15, %16 : vector<8x1xi32>
    %c8_i32 = arith.constant 8 : i32
    %18 = arith.muli %arg0, %c8_i32 : i32
    %19 = tpu.iota {dimensions = array<i32: 1>} : vector<1x8xi32>
    %20 = vector.broadcast %18 : i32 to vector<1x8xi32>
    %21 = arith.addi %20, %19 : vector<1x8xi32>
    %22 = tpu.iota {dimensions = array<i32: 0>} : vector<8x1xi32>
    %23 = vector.broadcast %22 : vector<8x1xi32> to vector<8x8xi32>
    %24 = vector.broadcast %21 : vector<1x8xi32> to vector<8x8xi32>
    %25 = arith.cmpi ne, %23, %24 : vector<8x8xi32>
    %26 = vector.broadcast %14 : vector<8x1xi32> to vector<8x8xi32>
    %27 = vector.broadcast %13 : vector<1x8xi32> to vector<8x8xi32>
    %28 = arith.cmpi eq, %26, %27 : vector<8x8xi32>
    %29 = arith.andi %28, %25 : vector<8x8xi1>
    %30 = vector.broadcast %17 : vector<8x1xi1> to vector<8x8xi1>
    %31 = arith.andi %29, %30 : vector<8x8xi1>
    %cst_15 = arith.constant dense<true> : vector<8x8xi1>
    %32 = arith.xori %28, %cst_15 : vector<8x8xi1>
    %33 = vector.broadcast %17 : vector<8x1xi1> to vector<8x8xi1>
    %34 = arith.andi %32, %33 : vector<8x8xi1>
    %cst_16 = arith.constant 0.000000e+00 : f32
    %35 = vector.broadcast %cst_16 : f32 to vector<8x8xf32>
    %36 = arith.select %31, %12, %35 : vector<8x8xi1>, vector<8x8xf32>
    %cst_17 = arith.constant dense<0xFF800000> : vector<8xf32>
    %37 = vector.multi_reduction <maximumf>, %36, %cst_17 [0] : vector<8x8xf32> to vector<8xf32>
    %38 = vector.shape_cast %37 : vector<8xf32> to vector<1x8xf32>
    %cst_18 = arith.constant 1.000000e+09 : f32
    %39 = vector.broadcast %cst_18 : f32 to vector<8x8xf32>
    %40 = arith.select %34, %12, %39 : vector<8x8xi1>, vector<8x8xf32>
    %cst_19 = arith.constant dense<0x7F800000> : vector<8xf32>
    %41 = vector.multi_reduction <minimumf>, %40, %cst_19 [0] : vector<8x8xf32> to vector<8xf32>
    %42 = vector.shape_cast %41 : vector<8xf32> to vector<1x8xf32>
    %cst_20 = arith.constant 0.000000e+00 : f32
    %43 = vector.shape_cast %17 : vector<8x1xi1> to vector<8x1xi1>
    %44 = vector.broadcast %43 : vector<8x1xi1> to vector<8x8xi1>
    %45 = vector.broadcast %cst_20 : f32 to vector<8x8xf32>
    %46 = arith.select %44, %12, %45 : vector<8x8xi1>, vector<8x8xf32>
    %cst_21 = arith.constant dense<0xFF800000> : vector<8xf32>
    %47 = vector.multi_reduction <maximumf>, %46, %cst_21 [0] : vector<8x8xf32> to vector<8xf32>
    %48 = vector.shape_cast %47 : vector<8xf32> to vector<1x8xf32>
    %cst_22 = arith.constant 4.500000e+00 : f32
    %49 = vector.broadcast %cst_22 : f32 to vector<1x8xf32>
    %50 = arith.cmpf ogt, %42, %49 : vector<1x8xf32>
    %51 = arith.select %50, %48, %42 : vector<1x8xi1>, vector<1x8xf32>
    %52 = math.sqrt %38 : vector<1x8xf32>
    %53 = math.sqrt %51 : vector<1x8xf32>
    %54 = arith.subf %52, %53 : vector<1x8xf32>
    %cst_23 = arith.constant 5.000000e-01 : f32
    %55 = vector.broadcast %cst_23 : f32 to vector<1x8xf32>
    %56 = arith.addf %54, %55 : vector<1x8xf32>
    %cst_24 = arith.constant 0.000000e+00 : f32
    %57 = vector.broadcast %cst_24 : f32 to vector<1x8xf32>
    %58 = arith.maximumf %56, %57 : vector<1x8xf32>
    %c0_25 = arith.constant 0 : index
    %c0_26 = arith.constant 0 : index
    %59 = vector.load %arg8[%c0_25, %c0_26] : memref<1x8xf32, #tpu.memory_space<vmem>>, vector<1x8xf32>
    tpu.vector_store %arg8[%c0_25, %c0_26], %58 {strides = array<i32>} : memref<1x8xf32, #tpu.memory_space<vmem>>, vector<1x8xf32>,
    return
  }
  func.func @transform_0(%arg0: i32) -> (i32, i32) {
    %c0_i32 = arith.constant 0 : i32
    %c0_i32_0 = arith.constant 0 : i32
    return %c0_i32, %arg0 : i32, i32
  }
  func.func @transform_1(%arg0: i32) -> (i32, i32) {
    %c0_i32 = arith.constant 0 : i32
    %c0_i32_0 = arith.constant 0 : i32
    %c0_i32_1 = arith.constant 0 : i32
    return %c0_i32, %c0_i32_0 : i32, i32
  }
  func.func @transform_2(%arg0: i32) -> (i32, i32) {
    %c0_i32 = arith.constant 0 : i32
    %c0_i32_0 = arith.constant 0 : i32
    %c0_i32_1 = arith.constant 0 : i32
    return %c0_i32, %c0_i32_0 : i32, i32
  }
  func.func @transform_3(%arg0: i32) -> (i32, i32) {
    %c0_i32 = arith.constant 0 : i32
    %c0_i32_0 = arith.constant 0 : i32
    return %c0_i32, %arg0 : i32, i32
  }
  func.func @transform_4(%arg0: i32) -> (i32, i32) {
    %c0_i32 = arith.constant 0 : i32
    %c0_i32_0 = arith.constant 0 : i32
    %c0_i32_1 = arith.constant 0 : i32
    return %c0_i32, %c0_i32_0 : i32, i32
  }
  func.func @transform_5(%arg0: i32) -> (i32, i32) {
    %c0_i32 = arith.constant 0 : i32
    %c0_i32_0 = arith.constant 0 : i32
    return %c0_i32, %arg0 : i32, i32
  }
  func.func @transform_6(%arg0: i32) -> (i32, i32) {
    %c0_i32 = arith.constant 0 : i32
    %c0_i32_0 = arith.constant 0 : i32
    %c0_i32_1 = arith.constant 0 : i32
    return %c0_i32, %c0_i32_0 : i32, i32
  }
  func.func @transform_7(%arg0: i32) -> (i32, i32) {
    %c0_i32 = arith.constant 0 : i32
    %c0_i32_0 = arith.constant 0 : i32
    return %c0_i32, %arg0 : i32, i32
  }
}

module attributes {stable_mosaic.version = 11 : i64} {
  func.func @_triplet_mg_kernel(%arg0: i32, %arg1: memref<1x8xi32, #tpu.memory_space<vmem>>, %arg2: memref<8x1xi32, #tpu.memory_space<vmem>>, %arg3: memref<8x1xi32, #tpu.memory_space<vmem>>, %arg4: memref<1x8xf32, #tpu.memory_space<vmem>>, %arg5: memref<8x1xf32, #tpu.memory_space<vmem>>, %arg6: memref<128x8xf32, #tpu.memory_space<vmem>>, %arg7: memref<8x128xf32, #tpu.memory_space<vmem>>, %arg8: memref<1x8xf32, #tpu.memory_space<vmem>>) attributes {dimension_semantics = [#tpu.dimension_semantics<parallel>], iteration_bounds = array<i64: 1>, scalar_prefetch = 0 : i64, scratch_operands = 0 : i64, tpu.core_type = #tpu.core_type<tc>, window_params = [{transform_indices = @transform_0, window_bounds = array<i64: 1, 8>}, {pipeline_mode = #tpu.pipeline_mode<synchronous>, transform_indices = @transform_1, window_bounds = array<i64: 8, 1>}, {pipeline_mode = #tpu.pipeline_mode<synchronous>, transform_indices = @transform_2, window_bounds = array<i64: 8, 1>}, {transform_indices = @transform_3, window_bounds = array<i64: 1, 8>}, {pipeline_mode = #tpu.pipeline_mode<synchronous>, transform_indices = @transform_4, window_bounds = array<i64: 8, 1>}, {transform_indices = @transform_5, window_bounds = array<i64: 128, 8>}, {pipeline_mode = #tpu.pipeline_mode<synchronous>, transform_indices = @transform_6, window_bounds = array<i64: 8, 128>}, {transform_indices = @transform_7, window_bounds = array<i64: 1, 8>}]} {
    %c0 = arith.constant 0 : index
    %c0_0 = arith.constant 0 : index
    %0 = vector.load %arg7[%c0, %c0_0] : memref<8x128xf32, #tpu.memory_space<vmem>>, vector<8x128xf32>
    %c0_1 = arith.constant 0 : index
    %c0_2 = arith.constant 0 : index
    %1 = vector.load %arg6[%c0_1, %c0_2] : memref<128x8xf32, #tpu.memory_space<vmem>>, vector<128x8xf32>
    %cst = arith.constant dense<0.000000e+00> : vector<8x8xf32>
    %2 = tpu.matmul %0, %1, %cst {dimension_numbers = #tpu.dot_dimension_numbers<[1], [0], [0], [1], [0, 0, 1, 1], [], []>} : vector<8x128xf32>, vector<128x8xf32>, vector<8x8xf32> -> vector<8x8xf32>
    %c0_3 = arith.constant 0 : index
    %c0_4 = arith.constant 0 : index
    %3 = vector.load %arg4[%c0_3, %c0_4] : memref<1x8xf32, #tpu.memory_space<vmem>>, vector<1x8xf32>
    %c0_5 = arith.constant 0 : index
    %c0_6 = arith.constant 0 : index
    %4 = vector.load %arg5[%c0_5, %c0_6] : memref<8x1xf32, #tpu.memory_space<vmem>>, vector<8x1xf32>
    %5 = vector.broadcast %4 : vector<8x1xf32> to vector<8x8xf32>
    %6 = vector.broadcast %3 : vector<1x8xf32> to vector<8x8xf32>
    %7 = arith.addf %5, %6 : vector<8x8xf32>
    %cst_7 = arith.constant 2.000000e+00 : f32
    %8 = vector.broadcast %cst_7 : f32 to vector<8x8xf32>
    %9 = arith.mulf %8, %2 : vector<8x8xf32>
    %10 = arith.subf %7, %9 : vector<8x8xf32>
    %cst_8 = arith.constant 0.000000e+00 : f32
    %11 = vector.broadcast %cst_8 : f32 to vector<8x8xf32>
    %12 = arith.maximumf %10, %11 : vector<8x8xf32>
    %c0_9 = arith.constant 0 : index
    %c0_10 = arith.constant 0 : index
    %13 = vector.load %arg1[%c0_9, %c0_10] : memref<1x8xi32, #tpu.memory_space<vmem>>, vector<1x8xi32>
    %c0_11 = arith.constant 0 : index
    %c0_12 = arith.constant 0 : index
    %14 = vector.load %arg2[%c0_11, %c0_12] : memref<8x1xi32, #tpu.memory_space<vmem>>, vector<8x1xi32>
    %c0_13 = arith.constant 0 : index
    %c0_14 = arith.constant 0 : index
    %15 = vector.load %arg3[%c0_13, %c0_14] : memref<8x1xi32, #tpu.memory_space<vmem>>, vector<8x1xi32>
    %c0_i32 = arith.constant 0 : i32
    %16 = vector.broadcast %c0_i32 : i32 to vector<8x1xi32>
    %17 = arith.cmpi ne, %15, %16 : vector<8x1xi32>
    %c8_i32 = arith.constant 8 : i32
    %18 = arith.muli %arg0, %c8_i32 : i32
    %19 = tpu.iota {dimensions = array<i32: 1>} : vector<1x8xi32>
    %20 = vector.broadcast %18 : i32 to vector<1x8xi32>
    %21 = arith.addi %20, %19 : vector<1x8xi32>
    %22 = tpu.iota {dimensions = array<i32: 0>} : vector<8x1xi32>
    %23 = vector.broadcast %22 : vector<8x1xi32> to vector<8x8xi32>
    %24 = vector.broadcast %21 : vector<1x8xi32> to vector<8x8xi32>
    %25 = arith.cmpi ne, %23, %24 : vector<8x8xi32>
    %26 = vector.broadcast %14 : vector<8x1xi32> to vector<8x8xi32>
    %27 = vector.broadcast %13 : vector<1x8xi32> to vector<8x8xi32>
    %28 = arith.cmpi eq, %26, %27 : vector<8x8xi32>
    %29 = arith.andi %28, %25 : vector<8x8xi1>
    %30 = vector.broadcast %17 : vector<8x1xi1> to vector<8x8xi1>
    %31 = arith.andi %29, %30 : vector<8x8xi1>
    %cst_15 = arith.constant dense<true> : vector<8x8xi1>
    %32 = arith.xori %28, %cst_15 : vector<8x8xi1>
    %33 = vector.broadcast %17 : vector<8x1xi1> to vector<8x8xi1>
    %34 = arith.andi %32, %33 : vector<8x8xi1>
    %cst_16 = arith.constant 0.000000e+00 : f32
    %35 = vector.broadcast %cst_16 : f32 to vector<8x8xf32>
    %36 = arith.select %31, %12, %35 : vector<8x8xi1>, vector<8x8xf32>
    %cst_17 = arith.constant dense<0xFF800000> : vector<8xf32>
    %37 = vector.multi_reduction <maximumf>, %36, %cst_17 [0] : vector<8x8xf32> to vector<8xf32>
    %38 = vector.shape_cast %37 : vector<8xf32> to vector<1x8xf32>
    %cst_18 = arith.constant 1.000000e+09 : f32
    %39 = vector.broadcast %cst_18 : f32 to vector<8x8xf32>
    %40 = arith.select %34, %12, %39 : vector<8x8xi1>, vector<8x8xf32>
    %cst_19 = arith.constant dense<0x7F800000> : vector<8xf32>
    %41 = vector.multi_reduction <minimumf>, %40, %cst_19 [0] : vector<8x8xf32> to vector<8xf32>
    %42 = vector.shape_cast %41 : vector<8xf32> to vector<1x8xf32>
    %cst_20 = arith.constant 0.000000e+00 : f32
    %43 = vector.shape_cast %17 : vector<8x1xi1> to vector<8x1xi1>
    %44 = vector.broadcast %43 : vector<8x1xi1> to vector<8x8xi1>
    %45 = vector.broadcast %cst_20 : f32 to vector<8x8xf32>
    %46 = arith.select %44, %12, %45 : vector<8x8xi1>, vector<8x8xf32>
    %cst_21 = arith.constant dense<0xFF800000> : vector<8xf32>
    %47 = vector.multi_reduction <maximumf>, %46, %cst_21 [0] : vector<8x8xf32> to vector<8xf32>
    %48 = vector.shape_cast %47 : vector<8xf32> to vector<1x8xf32>
    %cst_22 = arith.constant 4.500000e+00 : f32
    %49 = vector.broadcast %cst_22 : f32 to vector<1x8xf32>
    %50 = arith.cmpf ogt, %42, %49 : vector<1x8xf32>
    %51 = arith.select %50, %48, %42 : vector<1x8xi1>, vector<1x8xf32>
    %52 = math.sqrt %38 : vector<1x8xf32>
    %53 = math.sqrt %51 : vector<1x8xf32>
    %54 = arith.subf %52, %53 : vector<1x8xf32>
    %cst_23 = arith.constant 5.000000e-01 : f32
    %55 = vector.broadcast %cst_23 : f32 to vector<1x8xf32>
    %56 = arith.addf %54, %55 : vector<1x8xf32>
    %cst_24 = arith.constant 0.000000e+00 : f32
    %57 = vector.broadcast %cst_24 : f32 to vector<1x8xf32>
    %58 = arith.maximumf %56, %57 : vector<1x8xf32>
    %c0_25 = arith.constant 0 : index
    %c0_26 = arith.constant 0 : index
    %59 = vector.load %arg8[%c0_25, %c0_26] : memref<1x8xf32, #tpu.memory_space<vmem>>, vector<1x8xf32>
    tpu.vector_store %arg8[%c0_25, %c0_26], %58 {strides = array<i32>} : memref<1x8xf32, #tpu.memory_space<vmem>>, vector<1x8xf32>,
    return
  }
  func.func @transform_0(%arg0: i32) -> (i32, i32) {
    %c0_i32 = arith.constant 0 : i32
    %c0_i32_0 = arith.constant 0 : i32
    return %c0_i32, %arg0 : i32, i32
  }
  func.func @transform_1(%arg0: i32) -> (i32, i32) {
    %c0_i32 = arith.constant 0 : i32
    %c0_i32_0 = arith.constant 0 : i32
    %c0_i32_1 = arith.constant 0 : i32
    return %c0_i32, %c0_i32_0 : i32, i32
  }
  func.func @transform_2(%arg0: i32) -> (i32, i32) {
    %c0_i32 = arith.constant 0 : i32
    %c0_i32_0 = arith.constant 0 : i32
    %c0_i32_1 = arith.constant 0 : i32
    return %c0_i32, %c0_i32_0 : i32, i32
  }
  func.func @transform_3(%arg0: i32) -> (i32, i32) {
    %c0_i32 = arith.constant 0 : i32
    %c0_i32_0 = arith.constant 0 : i32
    return %c0_i32, %arg0 : i32, i32
  }
  func.func @transform_4(%arg0: i32) -> (i32, i32) {
    %c0_i32 = arith.constant 0 : i32
    %c0_i32_0 = arith.constant 0 : i32
    %c0_i32_1 = arith.constant 0 : i32
    return %c0_i32, %c0_i32_0 : i32, i32
  }
  func.func @transform_5(%arg0: i32) -> (i32, i32) {
    %c0_i32 = arith.constant 0 : i32
    %c0_i32_0 = arith.constant 0 : i32
    return %c0_i32, %arg0 : i32, i32
  }
  func.func @transform_6(%arg0: i32) -> (i32, i32) {
    %c0_i32 = arith.constant 0 : i32
    %c0_i32_0 = arith.constant 0 : i32
    %c0_i32_1 = arith.constant 0 : i32
    return %c0_i32, %c0_i32_0 : i32, i32
  }
  func.func @transform_7(%arg0: i32) -> (i32, i32) {
    %c0_i32 = arith.constant 0 : i32
    %c0_i32_0 = arith.constant 0 : i32
    return %c0_i32, %arg0 : i32, i32
  }
}

</mosaic_0001>

<bundles_post_ra>
// kernel: tpu_custom_call.1
= control target key start
LH: loop header
LB: loop body
LE: loop exit
PB: predicated region body
PF: predicated region fallthrough
CT: control target
= control target key end

     0   :  { %v213_v2 = vmov 0   ;;  %s325_s0 = inlined_call_operand.vmem [shape: s32[1,8], index: 0, kind: input, shape index: {}]   ;;  %s326_s1 = inlined_call_operand.vmem [shape: s32[8,1], index: 1, kind: input, shape index: {}]   ;;  %s327_s2 = inlined_call_operand.vmem [shape: s32[8,1], index: 2, kind: input, shape index: {}]   ;;  %s328_s3 = inlined_call_operand.vmem [shape: f32[1,8], index: 3, kind: input, shape index: {}]   ;;  %s329_s4 = inlined_call_operand.vmem [shape: f32[8,1], index: 4, kind: input, shape index: {}]   ;;  %s330_s5 = inlined_call_operand.vmem [shape: f32[128,8], index: 5, kind: input, shape index: {}]   ;;  %s331_s6 = inlined_call_operand.vmem [shape: f32[8,128], index: 6, kind: input, shape index: {}]   ;;  %s332_s7 = inlined_call_operand.hbm [shape: f32[1,8], index: 7, kind: output, shape index: {}]  }
   0x1   :  { %v43_v0 = vld [vmem:[%s330_s5 + $0x78] sm:$0xff]  ;;  %v42_v1 = vld [vmem:[%s330_s5 + $0x70] sm:$0xff]  ;;  %179 = vset.pattern.permute.xlu0 %v213_v2  ;;  %v41_v3 = vld [vmem:[%s330_s5 + $0x68] sm:$0xff]  ;;  %180 = vset.pattern.permute.xlu1 %v213_v2 }
   0x2   :  { %44 = vmatpush.msra.mxu0 %v43_v0  ;;  %v40_v4 = vld [vmem:[%s330_s5 + $0x60] sm:$0xff]  ;;  %v39_v6 = vld [vmem:[%s330_s5 + $0x58] sm:$0xff] }
   0x3   :  { %v65_v5 = vld [vmem:[%s329_s4] sm:$0xff] }
   0x4   :  { %45 = vmatpush.msra.mxu0 %v42_v1  ;;  %68 = vperm.xlu0 %179, %v65_v5   ;;  %v80_v7 = vld [vmem:[%s327_s2] sm:$0xff] }
   0x5   :  { %vm81_vm0 = vcmp.ne.s32.totalorder %v80_v7, 0 }
   0x6   :  { %46 = vmatpush.msra.mxu0 %v41_v3 }
   0x8   :  { %47 = vmatpush.msra.mxu0 %v40_v4 }
   0x9   :  { %12 = vsyncpa [#allocation3], 0  ;;  %v38_v8 = vld [vmem:[%s330_s5 + $0x50] sm:$0xff]  ;;  %v96_v9 = vsel %vm81_vm0, 1, %v213_v2  ;;  %v37_v10 = vld [vmem:[%s330_s5 + $0x48] sm:$0xff]  ;;  %v83_v23 = vlaneseq  ;;  %vm214_vm5 = vmmov 1  }
   0xa   :  { %48 = vmatpush.msra.mxu0 %v39_v6  ;;  %98 = vperm.xlu1 %180, %v96_v9   ;;  %v79_v11 = vld [vmem:[%s326_s1] sm:$0xff]  ;;  %v35_v13 = vld [vmem:[%s330_s5 + $0x38] sm:$0xff]  ;;  %v34_v14 = vld [vmem:[%s330_s5 + $0x30] sm:$0xff]  ;;  %vm105_vm8 = vcmask 64512   ;;  %s167_s18 = sshll.u32 %s332_s7, 4  ;;  %vm158_vm15 = vcmask 57344   ;;  %s168_s18 = int_to_ptr.hbm [resolvable:$true] %s167_s18 }
   0xb   :  { %v36_v12 = vld [vmem:[%s330_s5 + $0x40] sm:$0xff]  ;;  %v33_v15 = vld [vmem:[%s330_s5 + $0x28] sm:$0xff]  ;;  %v31_v17 = vld [vmem:[%s330_s5 + $0x18] sm:$0xff]  ;;  %v84_v24 = vand.u32 127, %v83_v23  ;;  %v88_v25 = vshrl.u32 %v83_v23, 7 }
   0xc   :  { %49 = vmatpush.msra.mxu0 %v38_v8  ;;  %91 = vperm.xlu0 %179, %v79_v11   ;;  %v32_v16 = vld [vmem:[%s330_s5 + $0x20] sm:$0xff]  ;;  %v30_v18 = vld [vmem:[%s330_s5 + $0x10] sm:$0xff]  ;;  %v29_v19 = vld [vmem:[%s330_s5 + $0x8] sm:$0xff] }
   0xd   :  { %v28_v20 = vld [vmem:[%s330_s5] sm:$0xff]  ;;  %vm89_vm1 = vcmp.ne.s32.totalorder %v88_v25, %v84_v24 }
   0xe   :  { %50 = vmatpush.msra.mxu0 %v37_v10  ;;  %v27_v21 = vld [vmem:[%s331_s6] sm:$0xff] }
   0xf   :  { %v182_v26 = vld [vmem:[%s325_s0] ss:$0 sm:$0xff]  ;;  %s215_s0 = smov [#allocation2]  }
  0x10   :  { %51 = vmatpush.msra.mxu0 %v36_v12  ;;  %v181_v28 = vld [vmem:[%s328_s3] ss:$0 sm:$0xff]  ;;  %s165_s3 = sshll.u32 %s215_s0, 4  ;;  %s166_s3 = int_to_ptr.vmem [resolvable:$true] %s165_s3 }
  0x12   :  { %52 = vmatpush.msra.mxu0 %v35_v13 }
  0x14   :  { %53 = vmatpush.msra.mxu0 %v34_v14 }
  0x16   :  { %54 = vmatpush.msra.mxu0 %v33_v15 }
  0x18   :  { %55 = vmatpush.msra.mxu0 %v32_v16 }
  0x1a   :  { %56 = vmatpush.msra.mxu0 %v31_v17 }
  0x1c   :  { %57 = vmatpush.msra.mxu0 %v30_v18 }
  0x1e   :  { %58 = vmatpush.msra.mxu0 %v29_v19 }
  0x20   :  { %59 = vmatpush.msra.mxu0 %v28_v20 }
  0x21   :  { %60 = vmatmul.f32.vlgmr.msra.gmra.mxu0 %v27_v21 }
  0x76   :  { %v69_v22 = vpop.permute.xlu0 %68 }
  0x77   :  { %v74_v31 = vadd.f32 %v181_v28, %v69_v22 }
  0x7c   :  { %v99_v29 = vpop.permute.xlu1 %98 }
  0x7d   :  { %vm100_vm4 = vcmp.eq.s32.totalorder %v99_v29, 1 }
  0x7e   :  { %v92_v27 = vpop.permute.xlu0 %91 }
  0x7f   :  { %vm94_vm2 = vcmp.eq.s32.totalorder %v92_v27, %v182_v26 }
  0x80   :  { %vm95_vm3 = vmand %vm94_vm2, %vm89_vm1 }
  0x81   :  { %vm102_vm6 = vmxor %vm94_vm2, %vm214_vm5 }
  0x82   :  { %vm101_vm7 = vmand %vm95_vm3, %vm100_vm4 }
  0x83   :  { %vm103_vm9 = vmand %vm102_vm6, %vm100_vm4 }
  0x9e   :  { %v61_v30 = vpop.f32.mrf.mxu0 }
  0x9f   :  { %v75_v32 = vmul.f32 2.0, %v61_v30 }
  0xa1   :  { %v76_v33 = vsub.f32 %v74_v31, %v75_v32 }
  0xa3   :  { %v77_v34 = vmax.f32 %v76_v33, 0.0 }
  0xa5   :  { %v104_v35 = vsel %vm101_vm7, %v77_v34, 0.0  ;;  %v113_v36 = vsel %vm103_vm9, %v77_v34, 1e+09  ;;  %v121_v37 = vsel %vm100_vm4, %v77_v34, 0.0 }
  0xa6   :  { %v106_v38 = vsel %vm105_vm8, %v104_v35, -inf  ;;  %v114_v39 = vsel %vm105_vm8, %v113_v36, inf  ;;  %v122_v40 = vsel %vm105_vm8, %v121_v37, -inf }
  0xa7   :  { %v107_v41 = vrot.slane %v106_v38, 4  ;;  %v115_v42 = vrot.slane %v114_v39, 4  ;;  %v123_v43 = vrot.slane %v122_v40, 4 }
  0xa9   :  { %v108_v44 = vmax.f32 %v106_v38, %v107_v41  ;;  %v116_v45 = vmin.f32 %v114_v39, %v115_v42  ;;  %v124_v46 = vmax.f32 %v122_v40, %v123_v43 }
  0xab   :  { %v109_v47 = vrot.slane %v108_v44, 2  ;;  %v117_v48 = vrot.slane %v116_v45, 2  ;;  %v125_v49 = vrot.slane %v124_v46, 2 }
  0xad   :  { %v110_v50 = vmax.f32 %v108_v44, %v109_v47  ;;  %v118_v51 = vmin.f32 %v116_v45, %v117_v48  ;;  %v126_v52 = vmax.f32 %v124_v46, %v125_v49 }
  0xaf   :  { %v111_v53 = vrot.slane %v110_v50, 1  ;;  %v119_v54 = vrot.slane %v118_v51, 1  ;;  %v127_v55 = vrot.slane %v126_v52, 1 }
  0xb1   :  { %v112_v56 = vmax.f32 %v110_v50, %v111_v53  ;;  %v120_v57 = vmin.f32 %v118_v51, %v119_v54  ;;  %v128_v58 = vmax.f32 %v126_v52, %v127_v55 }
  0xb3   :  { %vm129_vm10 = vcmp.gt.f32.partialorder %v120_v57, 4.5  ;;  %183 = vrsqrt.f32 %v112_v56  ;;  %vm138_vm11 = vcmp.eq.f32.partialorder %v112_v56, inf  ;;  %v141_v11 = vand.u32 2147483648, %v112_v56 }
  0xb4   :  { %v130_v59 = vsel %vm129_vm10, %v128_v58, %v120_v57  ;;  %vm140_vm13 = vcmp.eq.f32.partialorder %v112_v56, 0.0 }
  0xb5   :  { %185 = vrsqrt.f32 %v130_v59  ;;  %vm150_vm12 = vcmp.eq.f32.partialorder %v130_v59, inf  ;;  %v153_v12 = vand.u32 2147483648, %v130_v59  ;;  %vm152_vm14 = vcmp.eq.f32.partialorder %v130_v59, 0.0 }
  0xb9   :  { %v184_v60 = vpop.eup %183 }
  0xba   :  { %v132_v61 = vmul.f32 %v184_v60, %v112_v56 }
  0xbb   :  { %v186_v62 = vpop.eup %185 }
  0xbc   :  { %v133_v63 = vmul.f32 %v184_v60, %v132_v61  ;;  %v144_v0 = vmul.f32 %v186_v62, %v130_v59 }
  0xbe   :  { %v134_v1 = vmul.f32 0.5, %v133_v63  ;;  %v145_v2 = vmul.f32 %v186_v62, %v144_v0 }
  0xc0   :  { %v135_v3 = vsub.f32 1.5, %v134_v1  ;;  %v146_v4 = vmul.f32 0.5, %v145_v2 }
  0xc2   :  { %v136_v5 = vmul.f32 %v184_v60, %v135_v3  ;;  %v147_v6 = vsub.f32 1.5, %v146_v4 }
  0xc4   :  { %v137_v7 = vmul.f32 %v136_v5, %v112_v56  ;;  %v148_v8 = vmul.f32 %v186_v62, %v147_v6 }
  0xc6   :  { %v139_v9 = vsel %vm138_vm11, %v112_v56, %v137_v7  ;;  %v149_v10 = vmul.f32 %v148_v8, %v130_v59 }
  0xc7   :  { %v142_v14 = vsel %vm140_vm13, %v141_v11, %v139_v9 }
  0xc8   :  { %v151_v13 = vsel %vm150_vm12, %v130_v59, %v149_v10 }
  0xc9   :  { %v154_v15 = vsel %vm152_vm14, %v153_v12, %v151_v13 }
  0xca   :  { %v155_v16 = vsub.f32 %v142_v14, %v154_v15 }
  0xcc   :  { %v156_v17 = vadd.f32 0.5, %v155_v16 }
  0xce   :  { %v157_v18 = vmax.f32 %v156_v17, 0.0 }
  0xd0   :  { %159 = vst.msk [vmem:[#allocation2] sm:$0x1] %vm158_vm15, %v157_v18 }
  0xd1   :  { %170 = dma.vmem_to_hbm [thread:$0]  %s166_s3, 16, %s168_s18, [#allocation3]  }
  0xd2   :  { %211 = dma.done.wait [#allocation3], 16  }
  0xd3   :  { %212 = vsyncadd [#allocation3], 4294967280 }
  0xd4   :  { %175 = vsyncpa [#allocation3], 1 }

// kernel: tpu_custom_call.1
= control target key start
LH: loop header
LB: loop body
LE: loop exit
PB: predicated region body
PF: predicated region fallthrough
CT: control target
= control target key end

     0   :  { %v213_v2 = vmov 0   ;;  %s325_s0 = inlined_call_operand.vmem [shape: s32[1,8], index: 0, kind: input, shape index: {}]   ;;  %s326_s1 = inlined_call_operand.vmem [shape: s32[8,1], index: 1, kind: input, shape index: {}]   ;;  %s327_s2 = inlined_call_operand.vmem [shape: s32[8,1], index: 2, kind: input, shape index: {}]   ;;  %s328_s3 = inlined_call_operand.vmem [shape: f32[1,8], index: 3, kind: input, shape index: {}]   ;;  %s329_s4 = inlined_call_operand.vmem [shape: f32[8,1], index: 4, kind: input, shape index: {}]   ;;  %s330_s5 = inlined_call_operand.vmem [shape: f32[128,8], index: 5, kind: input, shape index: {}]   ;;  %s331_s6 = inlined_call_operand.vmem [shape: f32[8,128], index: 6, kind: input, shape index: {}]   ;;  %s332_s7 = inlined_call_operand.hbm [shape: f32[1,8], index: 7, kind: output, shape index: {}]  }
   0x1   :  { %v43_v0 = vld [vmem:[%s330_s5 + $0x78] sm:$0xff]  ;;  %v42_v1 = vld [vmem:[%s330_s5 + $0x70] sm:$0xff]  ;;  %179 = vset.pattern.permute.xlu0 %v213_v2  ;;  %v41_v3 = vld [vmem:[%s330_s5 + $0x68] sm:$0xff]  ;;  %180 = vset.pattern.permute.xlu1 %v213_v2 }
   0x2   :  { %44 = vmatpush.msra.mxu0 %v43_v0  ;;  %v40_v4 = vld [vmem:[%s330_s5 + $0x60] sm:$0xff]  ;;  %v39_v6 = vld [vmem:[%s330_s5 + $0x58] sm:$0xff] }
   0x3   :  { %v65_v5 = vld [vmem:[%s329_s4] sm:$0xff] }
   0x4   :  { %45 = vmatpush.msra.mxu0 %v42_v1  ;;  %68 = vperm.xlu0 %179, %v65_v5   ;;  %v80_v7 = vld [vmem:[%s327_s2] sm:$0xff] }
   0x5   :  { %vm81_vm0 = vcmp.ne.s32.totalorder %v80_v7, 0 }
   0x6   :  { %46 = vmatpush.msra.mxu0 %v41_v3 }
   0x8   :  { %47 = vmatpush.msra.mxu0 %v40_v4 }
   0x9   :  { %12 = vsyncpa [#allocation3], 0  ;;  %v38_v8 = vld [vmem:[%s330_s5 + $0x50] sm:$0xff]  ;;  %v96_v9 = vsel %vm81_vm0, 1, %v213_v2  ;;  %v37_v10 = vld [vmem:[%s330_s5 + $0x48] sm:$0xff]  ;;  %v83_v23 = vlaneseq  ;;  %vm214_vm5 = vmmov 1  }
   0xa   :  { %48 = vmatpush.msra.mxu0 %v39_v6  ;;  %98 = vperm.xlu1 %180, %v96_v9   ;;  %v79_v11 = vld [vmem:[%s326_s1] sm:$0xff]  ;;  %v35_v13 = vld [vmem:[%s330_s5 + $0x38] sm:$0xff]  ;;  %v34_v14 = vld [vmem:[%s330_s5 + $0x30] sm:$0xff]  ;;  %vm105_vm8 = vcmask 64512   ;;  %s167_s18 = sshll.u32 %s332_s7, 4  ;;  %vm158_vm15 = vcmask 57344   ;;  %s168_s18 = int_to_ptr.hbm [resolvable:$true] %s167_s18 }
   0xb   :  { %v36_v12 = vld [vmem:[%s330_s5 + $0x40] sm:$0xff]  ;;  %v33_v15 = vld [vmem:[%s330_s5 + $0x28] sm:$0xff]  ;;  %v31_v17 = vld [vmem:[%s330_s5 + $0x18] sm:$0xff]  ;;  %v84_v24 = vand.u32 127, %v83_v23  ;;  %v88_v25 = vshrl.u32 %v83_v23, 7 }
   0xc   :  { %49 = vmatpush.msra.mxu0 %v38_v8  ;;  %91 = vperm.xlu0 %179, %v79_v11   ;;  %v32_v16 = vld [vmem:[%s330_s5 + $0x20] sm:$0xff]  ;;  %v30_v18 = vld [vmem:[%s330_s5 + $0x10] sm:$0xff]  ;;  %v29_v19 = vld [vmem:[%s330_s5 + $0x8] sm:$0xff] }
   0xd   :  { %v28_v20 = vld [vmem:[%s330_s5] sm:$0xff]  ;;  %vm89_vm1 = vcmp.ne.s32.totalorder %v88_v25, %v84_v24 }
   0xe   :  { %50 = vmatpush.msra.mxu0 %v37_v10  ;;  %v27_v21 = vld [vmem:[%s331_s6] sm:$0xff] }
   0xf   :  { %v182_v26 = vld [vmem:[%s325_s0] ss:$0 sm:$0xff]  ;;  %s215_s0 = smov [#allocation2]  }
  0x10   :  { %51 = vmatpush.msra.mxu0 %v36_v12  ;;  %v181_v28 = vld [vmem:[%s328_s3] ss:$0 sm:$0xff]  ;;  %s165_s3 = sshll.u32 %s215_s0, 4  ;;  %s166_s3 = int_to_ptr.vmem [resolvable:$true] %s165_s3 }
  0x12   :  { %52 = vmatpush.msra.mxu0 %v35_v13 }
  0x14   :  { %53 = vmatpush.msra.mxu0 %v34_v14 }
  0x16   :  { %54 = vmatpush.msra.mxu0 %v33_v15 }
  0x18   :  { %55 = vmatpush.msra.mxu0 %v32_v16 }
  0x1a   :  { %56 = vmatpush.msra.mxu0 %v31_v17 }
  0x1c   :  { %57 = vmatpush.msra.mxu0 %v30_v18 }
  0x1e   :  { %58 = vmatpush.msra.mxu0 %v29_v19 }
  0x20   :  { %59 = vmatpush.msra.mxu0 %v28_v20 }
  0x21   :  { %60 = vmatmul.f32.vlgmr.msra.gmra.mxu0 %v27_v21 }
  0x76   :  { %v69_v22 = vpop.permute.xlu0 %68 }
  0x77   :  { %v74_v31 = vadd.f32 %v181_v28, %v69_v22 }
  0x7c   :  { %v99_v29 = vpop.permute.xlu1 %98 }
  0x7d   :  { %vm100_vm4 = vcmp.eq.s32.totalorder %v99_v29, 1 }
  0x7e   :  { %v92_v27 = vpop.permute.xlu0 %91 }
  0x7f   :  { %vm94_vm2 = vcmp.eq.s32.totalorder %v92_v27, %v182_v26 }
  0x80   :  { %vm95_vm3 = vmand %vm94_vm2, %vm89_vm1 }
  0x81   :  { %vm102_vm6 = vmxor %vm94_vm2, %vm214_vm5 }
  0x82   :  { %vm101_vm7 = vmand %vm95_vm3, %vm100_vm4 }
  0x83   :  { %vm103_vm9 = vmand %vm102_vm6, %vm100_vm4 }
  0x9e   :  { %v61_v30 = vpop.f32.mrf.mxu0 }
  0x9f   :  { %v75_v32 = vmul.f32 2.0, %v61_v30 }
  0xa1   :  { %v76_v33 = vsub.f32 %v74_v31, %v75_v32 }
  0xa3   :  { %v77_v34 = vmax.f32 %v76_v33, 0.0 }
  0xa5   :  { %v104_v35 = vsel %vm101_vm7, %v77_v34, 0.0  ;;  %v113_v36 = vsel %vm103_vm9, %v77_v34, 1e+09  ;;  %v121_v37 = vsel %vm100_vm4, %v77_v34, 0.0 }
  0xa6   :  { %v106_v38 = vsel %vm105_vm8, %v104_v35, -inf  ;;  %v114_v39 = vsel %vm105_vm8, %v113_v36, inf  ;;  %v122_v40 = vsel %vm105_vm8, %v121_v37, -inf }
  0xa7   :  { %v107_v41 = vrot.slane %v106_v38, 4  ;;  %v115_v42 = vrot.slane %v114_v39, 4  ;;  %v123_v43 = vrot.slane %v122_v40, 4 }
  0xa9   :  { %v108_v44 = vmax.f32 %v106_v38, %v107_v41  ;;  %v116_v45 = vmin.f32 %v114_v39, %v115_v42  ;;  %v124_v46 = vmax.f32 %v122_v40, %v123_v43 }
  0xab   :  { %v109_v47 = vrot.slane %v108_v44, 2  ;;  %v117_v48 = vrot.slane %v116_v45, 2  ;;  %v125_v49 = vrot.slane %v124_v46, 2 }
  0xad   :  { %v110_v50 = vmax.f32 %v108_v44, %v109_v47  ;;  %v118_v51 = vmin.f32 %v116_v45, %v117_v48  ;;  %v126_v52 = vmax.f32 %v124_v46, %v125_v49 }
  0xaf   :  { %v111_v53 = vrot.slane %v110_v50, 1  ;;  %v119_v54 = vrot.slane %v118_v51, 1  ;;  %v127_v55 = vrot.slane %v126_v52, 1 }
  0xb1   :  { %v112_v56 = vmax.f32 %v110_v50, %v111_v53  ;;  %v120_v57 = vmin.f32 %v118_v51, %v119_v54  ;;  %v128_v58 = vmax.f32 %v126_v52, %v127_v55 }
  0xb3   :  { %vm129_vm10 = vcmp.gt.f32.partialorder %v120_v57, 4.5  ;;  %183 = vrsqrt.f32 %v112_v56  ;;  %vm138_vm11 = vcmp.eq.f32.partialorder %v112_v56, inf  ;;  %v141_v11 = vand.u32 2147483648, %v112_v56 }
  0xb4   :  { %v130_v59 = vsel %vm129_vm10, %v128_v58, %v120_v57  ;;  %vm140_vm13 = vcmp.eq.f32.partialorder %v112_v56, 0.0 }
  0xb5   :  { %185 = vrsqrt.f32 %v130_v59  ;;  %vm150_vm12 = vcmp.eq.f32.partialorder %v130_v59, inf  ;;  %v153_v12 = vand.u32 2147483648, %v130_v59  ;;  %vm152_vm14 = vcmp.eq.f32.partialorder %v130_v59, 0.0 }
  0xb9   :  { %v184_v60 = vpop.eup %183 }
  0xba   :  { %v132_v61 = vmul.f32 %v184_v60, %v112_v56 }
  0xbb   :  { %v186_v62 = vpop.eup %185 }
  0xbc   :  { %v133_v63 = vmul.f32 %v184_v60, %v132_v61  ;;  %v144_v0 = vmul.f32 %v186_v62, %v130_v59 }
  0xbe   :  { %v134_v1 = vmul.f32 0.5, %v133_v63  ;;  %v145_v2 = vmul.f32 %v186_v62, %v144_v0 }
  0xc0   :  { %v135_v3 = vsub.f32 1.5, %v134_v1  ;;  %v146_v4 = vmul.f32 0.5, %v145_v2 }
  0xc2   :  { %v136_v5 = vmul.f32 %v184_v60, %v135_v3  ;;  %v147_v6 = vsub.f32 1.5, %v146_v4 }
  0xc4   :  { %v137_v7 = vmul.f32 %v136_v5, %v112_v56  ;;  %v148_v8 = vmul.f32 %v186_v62, %v147_v6 }
  0xc6   :  { %v139_v9 = vsel %vm138_vm11, %v112_v56, %v137_v7  ;;  %v149_v10 = vmul.f32 %v148_v8, %v130_v59 }
  0xc7   :  { %v142_v14 = vsel %vm140_vm13, %v141_v11, %v139_v9 }
  0xc8   :  { %v151_v13 = vsel %vm150_vm12, %v130_v59, %v149_v10 }
  0xc9   :  { %v154_v15 = vsel %vm152_vm14, %v153_v12, %v151_v13 }
  0xca   :  { %v155_v16 = vsub.f32 %v142_v14, %v154_v15 }
  0xcc   :  { %v156_v17 = vadd.f32 0.5, %v155_v16 }
  0xce   :  { %v157_v18 = vmax.f32 %v156_v17, 0.0 }
  0xd0   :  { %159 = vst.msk [vmem:[#allocation2] sm:$0x1] %vm158_vm15, %v157_v18 }
  0xd1   :  { %170 = dma.vmem_to_hbm [thread:$0]  %s166_s3, 16, %s168_s18, [#allocation3]  }
  0xd2   :  { %211 = dma.done.wait [#allocation3], 16  }
  0xd3   :  { %212 = vsyncadd [#allocation3], 4294967280 }
  0xd4   :  { %175 = vsyncpa [#allocation3], 1 }

</bundles_post_ra>
